<compile_context>
chip_gen: v7x
topology: tpu7x:2x2x1
jax: 0.10.0
libtpu: 0.0.40
codegen_flags: <defaults>
</compile_context>

<pallas_src>
import functools

import jax
import jax.numpy as jnp
from jax.experimental import pallas as pl
from jax.experimental.pallas import tpu as pltpu


def gcn_kernel(a_ref, x_ref, w1_ref, b1_ref, wc_ref, bc_ref, wl_ref, bl_ref,
               logp_ref, logits_ref):
    a = a_ref[...]                                               # [N, N] f32

    # SGConv (K=1), aggregate-first (FEAT < HIDDEN):
    #   h = relu( (A_hat @ x) @ W1 + b1 )
    ax = jnp.dot(a, x_ref[...], preferred_element_type=jnp.float32)    # [N, F]
    h = jnp.dot(ax, w1_ref[...], preferred_element_type=jnp.float32)   # [N, H]
    h = jnp.maximum(h + b1_ref[...], 0.0)
    # TODO(synk): F.dropout(x, p, training=self.training) -> identity here
    # (inference-mode; no stochastic mask).

    num_convs = wc_ref.shape[0]                                  # num_layers - 1
    for i in range(num_convs):                                   # static unroll
        xw = jnp.dot(h, wc_ref[i], preferred_element_type=jnp.float32)  # [N, H]
        hi = jnp.dot(a, xw, preferred_element_type=jnp.float32) + bc_ref[i]
        # x = F.dropout(F.relu(x + h))
        # TODO(synk): this inner F.dropout defaults to training=True in the
        # PyTorch code; treated as identity (inference) here.
        h = jnp.maximum(h + hi, 0.0)

    # lin1: logits = h @ W_lin + b_lin.  Class dim was pre-padded to 128 lanes
    # at model-load time, so both stores below are unmasked / lane-dense.
    logits = jnp.dot(h, wl_ref[...],
                     preferred_element_type=jnp.float32) + bl_ref[...]
    logits_ref[...] = logits

    # log_softmax over classes; padded classes carry -1e30 logits -> exp == 0,
    # so they do not perturb the valid columns.
    m = jnp.max(logits, axis=1, keepdims=True)
    z = logits - m
    lse = jnp.log(jnp.sum(jnp.exp(z), axis=1, keepdims=True))
    logp_ref[...] = z - lse


def gcn_norm_dense(adj):
    """Dense GCN normalization: D^-1/2 (A + I) D^-1/2 (self-loops added)."""
    n = adj.shape[0]
    a_hat = adj + jnp.eye(n, dtype=jnp.float32)
    d = jnp.sum(a_hat, axis=1)
    d_inv_sqrt = jnp.where(d > 0, jax.lax.rsqrt(jnp.maximum(d, 1e-12)), 0.0)
    return d_inv_sqrt[:, None] * a_hat * d_inv_sqrt[None, :]


def prepare_gcn_params(adj, w1, b1, w_convs, b_convs, w_lin, b_lin):
    """One-time (model/graph load) preparation, hoisted out of the forward.

    Builds the normalized adjacency for the static graph and the lane-dense
    (128-multiple) padded classifier; padded classes get a -1e30 bias so
    log_softmax over the padded row equals log_softmax over the real classes.
    """
    c = w_lin.shape[1]
    c_pad = ((c + 127) // 128) * 128

    a_hat = gcn_norm_dense(adj.astype(jnp.float32))

    wl_pad = jnp.zeros((w_lin.shape[0], c_pad), jnp.float32).at[:, :c].set(w_lin)
    bl_pad = jnp.full((1, c_pad), -1e30, jnp.float32).at[0, :c].set(b_lin)

    params = dict(
        a_hat=a_hat,
        w1=w1.astype(jnp.float32),
        b1=b1.reshape(1, -1).astype(jnp.float32),
        w_convs=w_convs.astype(jnp.float32),
        b_convs=b_convs.reshape(b_convs.shape[0], 1,
                                b_convs.shape[1]).astype(jnp.float32),
        wl=wl_pad,
        bl=bl_pad,
    )
    # Materialize once so no per-forward eager prep work remains.
    return jax.tree_util.tree_map(jax.block_until_ready, params), c


@functools.partial(jax.jit, static_argnames=("num_classes",))
def gcn_forward(x, a_hat, w1, b1, w_convs, b_convs, wl, bl, *, num_classes):
    n = x.shape[0]
    c_pad = wl.shape[1]

    vmem = pl.BlockSpec(memory_space=pltpu.MemorySpace.VMEM)
    # NOTE (scale-up plan): at N=64 the whole problem fits in VMEM with no
    # grid.  For large N this becomes one row-tiled pallas_call per layer with
    # dimension_semantics=("parallel","arbitrary") (v7x has 2 TCs), tiles
    # re-sized for v7x's 64 MiB VMEM, and vmem_limit_bytes raised on v5e.
    logp, logits = pl.pallas_call(
        gcn_kernel,
        out_shape=(jax.ShapeDtypeStruct((n, c_pad), jnp.float32),
                   jax.ShapeDtypeStruct((n, c_pad), jnp.float32)),
        in_specs=[vmem] * 8,
        out_specs=(vmem, vmem),
    )(a_hat, x.astype(jnp.float32), w1, b1, w_convs, b_convs, wl, bl)

    return logp[:, :num_classes], logits[:, :num_classes]


def gcn_reference(x, adj, w1, b1, w_convs, b_convs, w_lin, b_lin):
    """Pure-JAX f32 reference of the same forward pass."""
    a = gcn_norm_dense(adj)
    h = jnp.maximum(a @ (x @ w1) + b1[None, :], 0.0)
    for i in range(w_convs.shape[0]):
        hi = a @ (h @ w_convs[i]) + b_convs[i][None, :]
        h = jnp.maximum(h + hi, 0.0)
    logits = h @ w_lin + b_lin[None, :]
    logp = jax.nn.log_softmax(logits, axis=1)
    return logp, logits


def xavier_uniform(key, shape):
    fan_in, fan_out = shape[0], shape[1]
    limit = (6.0 / (fan_in + fan_out)) ** 0.5
    return jax.random.uniform(key, shape, jnp.float32, -limit, limit)


if __name__ == "__main__":
    N = 64           # number of graph nodes
    FEAT = 16        # dataset.num_features
    HIDDEN = 32      # args.hidden
    CLASSES = 8      # dataset.num_classes
    NUM_LAYERS = 3   # 1 SGConv + (NUM_LAYERS - 1) GCNConv

    key = jax.random.PRNGKey(0)
    k_x, k_adj, k_w1, k_b1, k_wc, k_bc, k_wl, k_bl = jax.random.split(key, 8)

    # Node features.
    x = jax.random.normal(k_x, (N, FEAT), jnp.float32)

    # Deterministic random symmetric binary adjacency + a ring so every node
    # has at least one neighbor (nonzero degree).
    rand_a = (jax.random.uniform(k_adj, (N, N)) < 0.05).astype(jnp.float32)
    ring = jnp.roll(jnp.eye(N, dtype=jnp.float32), 1, axis=1)
    adj = rand_a + rand_a.T + ring + ring.T
    adj = (adj > 0).astype(jnp.float32)
    adj = adj * (1.0 - jnp.eye(N, dtype=jnp.float32))   # no self loops (added in norm)

    # Parameters (deterministic).
    w1 = xavier_uniform(k_w1, (FEAT, HIDDEN))
    b1 = 0.01 * jax.random.normal(k_b1, (HIDDEN,), jnp.float32)
    w_convs = jnp.stack([xavier_uniform(k, (HIDDEN, HIDDEN))
                         for k in jax.random.split(k_wc, NUM_LAYERS - 1)])
    b_convs = 0.01 * jax.random.normal(k_bc, (NUM_LAYERS - 1, HIDDEN), jnp.float32)
    w_lin = xavier_uniform(k_wl, (HIDDEN, CLASSES))
    b_lin = 0.01 * jax.random.normal(k_bl, (CLASSES,), jnp.float32)

    # One-time model/graph-load preparation (hoisted out of the forward path).
    params, num_classes = prepare_gcn_params(adj, w1, b1, w_convs, b_convs,
                                             w_lin, b_lin)

    logp, logits = gcn_forward(
        x, params["a_hat"], params["w1"], params["b1"], params["w_convs"],
        params["b_convs"], params["wl"], params["bl"], num_classes=num_classes)
    logp = jax.block_until_ready(logp)
    logits = jax.block_until_ready(logits)

    assert logp.shape == (N, CLASSES)
    assert logits.shape == (N, CLASSES)
    # log_softmax rows must exponentiate-sum to ~1.
    assert bool(jnp.all(jnp.abs(jnp.sum(jnp.exp(logp), axis=1) - 1.0) < 1e-3))

    # Compare against the f32 pure-JAX reference (kernel now runs all-f32).
    ref_logp, ref_logits = gcn_reference(x, adj, w1, b1, w_convs, b_convs,
                                         w_lin, b_lin)
    assert bool(jnp.max(jnp.abs(logits - ref_logits)) < 5e-2)
    assert bool(jnp.max(jnp.abs(logp - ref_logp)) < 5e-2)

    print("KERNEL_OK")
</pallas_src>

<mosaic_0001>
module attributes {stable_mosaic.version = 11 : i64} {
  func.func @gcn_kernel(%arg0: memref<64x64xf32, #tpu.memory_space<vmem>>, %arg1: memref<64x16xf32, #tpu.memory_space<vmem>>, %arg2: memref<16x32xf32, #tpu.memory_space<vmem>>, %arg3: memref<1x32xf32, #tpu.memory_space<vmem>>, %arg4: memref<2x32x32xf32, #tpu.memory_space<vmem>>, %arg5: memref<2x1x32xf32, #tpu.memory_space<vmem>>, %arg6: memref<32x128xf32, #tpu.memory_space<vmem>>, %arg7: memref<1x128xf32, #tpu.memory_space<vmem>>, %arg8: memref<64x128xf32, #tpu.memory_space<vmem>>, %arg9: memref<64x128xf32, #tpu.memory_space<vmem>>) attributes {dimension_semantics = [], scalar_prefetch = 0 : i64, scratch_operands = 0 : i64, tpu.core_type = #tpu.core_type<tc>} {
    %c0 = arith.constant 0 : index
    %c0_0 = arith.constant 0 : index
    %0 = vector.load %arg0[%c0, %c0_0] : memref<64x64xf32, #tpu.memory_space<vmem>>, vector<64x64xf32>
    %c0_1 = arith.constant 0 : index
    %c0_2 = arith.constant 0 : index
    %1 = vector.load %arg1[%c0_1, %c0_2] : memref<64x16xf32, #tpu.memory_space<vmem>>, vector<64x16xf32>
    %cst = arith.constant dense<0.000000e+00> : vector<64x16xf32>
    %2 = tpu.matmul %0, %1, %cst {dimension_numbers = #tpu.dot_dimension_numbers<[1], [0], [0], [1], [0, 0, 1, 1], [], []>} : vector<64x64xf32>, vector<64x16xf32>, vector<64x16xf32> -> vector<64x16xf32>
    %c0_3 = arith.constant 0 : index
    %c0_4 = arith.constant 0 : index
    %3 = vector.load %arg2[%c0_3, %c0_4] : memref<16x32xf32, #tpu.memory_space<vmem>>, vector<16x32xf32>
    %cst_5 = arith.constant dense<0.000000e+00> : vector<64x32xf32>
    %4 = tpu.matmul %2, %3, %cst_5 {dimension_numbers = #tpu.dot_dimension_numbers<[1], [0], [0], [1], [0, 0, 1, 1], [], []>} : vector<64x16xf32>, vector<16x32xf32>, vector<64x32xf32> -> vector<64x32xf32>
    %c0_6 = arith.constant 0 : index
    %c0_7 = arith.constant 0 : index
    %5 = vector.load %arg3[%c0_6, %c0_7] : memref<1x32xf32, #tpu.memory_space<vmem>>, vector<1x32xf32>
    %6 = vector.broadcast %5 : vector<1x32xf32> to vector<64x32xf32>
    %7 = arith.addf %4, %6 : vector<64x32xf32>
    %cst_8 = arith.constant 0.000000e+00 : f32
    %8 = vector.broadcast %cst_8 : f32 to vector<64x32xf32>
    %9 = arith.maximumf %7, %8 : vector<64x32xf32>
    %c0_9 = arith.constant 0 : index
    %c0_10 = arith.constant 0 : index
    %c0_11 = arith.constant 0 : index
    %10 = vector.load %arg4[%c0_9, %c0_10, %c0_11] : memref<2x32x32xf32, #tpu.memory_space<vmem>>, vector<1x32x32xf32>
    %11 = vector.shape_cast %10 : vector<1x32x32xf32> to vector<32x32xf32>
    %cst_12 = arith.constant dense<0.000000e+00> : vector<64x32xf32>
    %12 = tpu.matmul %9, %11, %cst_12 {dimension_numbers = #tpu.dot_dimension_numbers<[1], [0], [0], [1], [0, 0, 1, 1], [], []>} : vector<64x32xf32>, vector<32x32xf32>, vector<64x32xf32> -> vector<64x32xf32>
    %cst_13 = arith.constant dense<0.000000e+00> : vector<64x32xf32>
    %13 = tpu.matmul %0, %12, %cst_13 {dimension_numbers = #tpu.dot_dimension_numbers<[1], [0], [0], [1], [0, 0, 1, 1], [], []>} : vector<64x64xf32>, vector<64x32xf32>, vector<64x32xf32> -> vector<64x32xf32>
    %c0_14 = arith.constant 0 : index
    %c0_15 = arith.constant 0 : index
    %c0_16 = arith.constant 0 : index
    %14 = vector.load %arg5[%c0_14, %c0_15, %c0_16] : memref<2x1x32xf32, #tpu.memory_space<vmem>>, vector<1x1x32xf32>
    %15 = vector.shape_cast %14 : vector<1x1x32xf32> to vector<1x32xf32>
    %16 = vector.broadcast %15 : vector<1x32xf32> to vector<64x32xf32>
    %17 = arith.addf %13, %16 : vector<64x32xf32>
    %18 = arith.addf %9, %17 : vector<64x32xf32>
    %cst_17 = arith.constant 0.000000e+00 : f32
    %19 = vector.broadcast %cst_17 : f32 to vector<64x32xf32>
    %20 = arith.maximumf %18, %19 : vector<64x32xf32>
    %c1 = arith.constant 1 : index
    %c0_18 = arith.constant 0 : index
    %c0_19 = arith.constant 0 : index
    %21 = vector.load %arg4[%c1, %c0_18, %c0_19] : memref<2x32x32xf32, #tpu.memory_space<vmem>>, vector<1x32x32xf32>
    %22 = vector.shape_cast %21 : vector<1x32x32xf32> to vector<32x32xf32>
    %cst_20 = arith.constant dense<0.000000e+00> : vector<64x32xf32>
    %23 = tpu.matmul %20, %22, %cst_20 {dimension_numbers = #tpu.dot_dimension_numbers<[1], [0], [0], [1], [0, 0, 1, 1], [], []>} : vector<64x32xf32>, vector<32x32xf32>, vector<64x32xf32> -> vector<64x32xf32>
    %cst_21 = arith.constant dense<0.000000e+00> : vector<64x32xf32>
    %24 = tpu.matmul %0, %23, %cst_21 {dimension_numbers = #tpu.dot_dimension_numbers<[1], [0], [0], [1], [0, 0, 1, 1], [], []>} : vector<64x64xf32>, vector<64x32xf32>, vector<64x32xf32> -> vector<64x32xf32>
    %c1_22 = arith.constant 1 : index
    %c0_23 = arith.constant 0 : index
    %c0_24 = arith.constant 0 : index
    %25 = vector.load %arg5[%c1_22, %c0_23, %c0_24] : memref<2x1x32xf32, #tpu.memory_space<vmem>>, vector<1x1x32xf32>
    %26 = vector.shape_cast %25 : vector<1x1x32xf32> to vector<1x32xf32>
    %27 = vector.broadcast %26 : vector<1x32xf32> to vector<64x32xf32>
    %28 = arith.addf %24, %27 : vector<64x32xf32>
    %29 = arith.addf %20, %28 : vector<64x32xf32>
    %cst_25 = arith.constant 0.000000e+00 : f32
    %30 = vector.broadcast %cst_25 : f32 to vector<64x32xf32>
    %31 = arith.maximumf %29, %30 : vector<64x32xf32>
    %c0_26 = arith.constant 0 : index
    %c0_27 = arith.constant 0 : index
    %32 = vector.load %arg6[%c0_26, %c0_27] : memref<32x128xf32, #tpu.memory_space<vmem>>, vector<32x128xf32>
    %cst_28 = arith.constant dense<0.000000e+00> : vector<64x128xf32>
    %33 = tpu.matmul %31, %32, %cst_28 {dimension_numbers = #tpu.dot_dimension_numbers<[1], [0], [0], [1], [0, 0, 1, 1], [], []>} : vector<64x32xf32>, vector<32x128xf32>, vector<64x128xf32> -> vector<64x128xf32>
    %c0_29 = arith.constant 0 : index
    %c0_30 = arith.constant 0 : index
    %34 = vector.load %arg7[%c0_29, %c0_30] : memref<1x128xf32, #tpu.memory_space<vmem>>, vector<1x128xf32>
    %35 = vector.broadcast %34 : vector<1x128xf32> to vector<64x128xf32>
    %36 = arith.addf %33, %35 : vector<64x128xf32>
    %c0_31 = arith.constant 0 : index
    %c0_32 = arith.constant 0 : index
    %37 = vector.load %arg9[%c0_31, %c0_32] : memref<64x128xf32, #tpu.memory_space<vmem>>, vector<64x128xf32>
    tpu.vector_store %arg9[%c0_31, %c0_32], %36 {strides = array<i32>} : memref<64x128xf32, #tpu.memory_space<vmem>>, vector<64x128xf32>,
    %cst_33 = arith.constant dense<0xFF800000> : vector<64xf32>
    %38 = vector.multi_reduction <maximumf>, %36, %cst_33 [1] : vector<64x128xf32> to vector<64xf32>
    %39 = vector.shape_cast %38 : vector<64xf32> to vector<64x1xf32>
    %40 = vector.broadcast %39 : vector<64x1xf32> to vector<64x128xf32>
    %41 = arith.subf %36, %40 : vector<64x128xf32>
    %42 = math.exp %41 : vector<64x128xf32>
    %cst_34 = arith.constant dense<0.000000e+00> : vector<64xf32>
    %43 = vector.multi_reduction <add>, %42, %cst_34 [1] : vector<64x128xf32> to vector<64xf32>
    %44 = vector.shape_cast %43 : vector<64xf32> to vector<64x1xf32>
    %45 = math.log %44 : vector<64x1xf32>
    %46 = vector.broadcast %45 : vector<64x1xf32> to vector<64x128xf32>
    %47 = arith.subf %41, %46 : vector<64x128xf32>
    %c0_35 = arith.constant 0 : index
    %c0_36 = arith.constant 0 : index
    %48 = vector.load %arg8[%c0_35, %c0_36] : memref<64x128xf32, #tpu.memory_space<vmem>>, vector<64x128xf32>
    tpu.vector_store %arg8[%c0_35, %c0_36], %47 {strides = array<i32>} : memref<64x128xf32, #tpu.memory_space<vmem>>, vector<64x128xf32>,
    return
  }
}

</mosaic_0001>

<bundles_post_ra>
// kernel: gcn_forward.1
= control target key start
LH: loop header
LB: loop body
LE: loop exit
PB: predicated region body
PF: predicated region fallthrough
CT: control target
= control target key end

     0   :  { %15 = vsyncpa [#allocation3], 0  ;;  %s2087_s0 = inlined_call_operand.vmem [shape: f32[64,64], index: 0, kind: input, shape index: {}]   ;;  %s2088_s1 = inlined_call_operand.vmem [shape: f32[64,16], index: 1, kind: input, shape index: {}]   ;;  %s2089_s2 = inlined_call_operand.hbm [shape: f32[16,32], index: 2, kind: input, shape index: {}]   ;;  %s2090_s3 = inlined_call_operand.hbm [shape: f32[1,32], index: 3, kind: input, shape index: {}]   ;;  %s2091_s4 = inlined_call_operand.hbm [shape: f32[2,32,32], index: 4, kind: input, shape index: {}]   ;;  %s2092_s5 = inlined_call_operand.vmem [shape: f32[2,1,32], index: 5, kind: input, shape index: {}]   ;;  %s2093_s6 = inlined_call_operand.vmem [shape: f32[32,128], index: 6, kind: input, shape index: {}]   ;;  %s2094_s7 = inlined_call_operand.vmem [shape: f32[1,128], index: 7, kind: input, shape index: {}]   ;;  %s2095_s8 = inlined_call_operand.vmem [shape: f32[64,128], index: 8, kind: output, shape index: {0}]   ;;  %s2096_s9 = inlined_call_operand.vmem [shape: f32[64,128], index: 9, kind: output, shape index: {1}]  }
   0x1   :  { %16 = vsyncpa [#allocation5], 0  ;;  %s1632_s30 = smov [#allocation4]   ;;  %s1633_s11 = smov [#allocation2]  }
   0x2   :  { %s39_s10 = sshll.u32 %s1632_s30, 4  ;;  %s26_s12 = sshll.u32 %s1633_s11, 4  ;;  %s40_s10 = int_to_ptr.vmem [resolvable:$true] %s39_s10  ;;  %s1687_s12 = int_to_ptr.vmem [resolvable:$true] %s26_s12 }
   0x3   :  { %s1562_s15 = scalar_lea.hbm %s2090_s3, 16 }
   0x4   :  { %p1563_p0 = scmp.ne.s32.totalorder %s2090_s3, %s1562_s15  ;;  %p1566_p1 = scmp.lt.u32.totalorder %s1562_s15, %s2090_s3 }
   0x6   :  { %p1568_p2 = pnand %p1566_p1, %p1563_p0 }
   0x8   :  { %1571 = shalt.err (!%p1568_p2)
}
   0x9   :  { %s1572_s20 = scalar_lea.vmem %s40_s10, 16  ;;  %s1576_s21 = scalar_lea.vmem %s40_s10, 32 }
   0xa   :  { %p1573_p3 = scmp.ne.s32.totalorder %s40_s10, %s1572_s20  ;;  %p1577_p4 = scmp.lt.s32.totalorder %s40_s10, %s40_s10 }
   0xb   :  { %p1578_p5 = scmp.lt.s32.totalorder %s1576_s21, %s1572_s20 }
   0xd   :  { %p1579_p6 = por %p1578_p5, %p1577_p4 }
   0xf   :  { %p1580_p7 = pnand %p1579_p6, %p1573_p3 }
  0x11   :  { %1583 = shalt.err (!%p1580_p7)
}
  0x12   :  { %42 = dma.hbm_to_vmem [thread:$0]  %s2090_s3, 16, %s40_s10, [#allocation5]  }
  0x13   :  { %s1584_s26 = scalar_lea.hbm %s2089_s2, 256 }
  0x14   :  { %p1585_p8 = scmp.ne.s32.totalorder %s2089_s2, %s1584_s26  ;;  %p1588_p9 = scmp.lt.u32.totalorder %s1584_s26, %s2089_s2 }
  0x16   :  { %p1590_p10 = pnand %p1588_p9, %p1585_p8 }
  0x18   :  { %1593 = shalt.err (!%p1590_p10)
}
  0x19   :  { %s1594_s11 = scalar_lea.vmem %s1687_s12, 256  ;;  %p1599_p12 = scmp.lt.s32.totalorder %s1687_s12, %s1687_s12 }
  0x1a   :  { %p1595_p11 = scmp.ne.s32.totalorder %s1687_s12, %s1594_s11  ;;  %p1600_p13 = scmp.lt.s32.totalorder %s1594_s11, %s1594_s11 }
  0x1c   :  { %p1601_p0 = por %p1600_p13, %p1599_p12 }
  0x1e   :  { %p1602_p1 = pnand %p1601_p0, %p1595_p11 }
  0x20   :  { %1605 = shalt.err (!%p1602_p1)
}
  0x21   :  { %s1634_s3 = smov 128   ;;  %s1635_s10 = smov 8  }
  0x22   :  { %32 = dma.hbm_to_vmem [thread:$0]  %s2089_s2, 256, %s1687_s12, [#allocation3], %s1634_s3, %s1634_s3, %s1635_s10  }
  0x23   :  { %s1636_s15 = smov [#allocation6]   ;;  %s1606_s19 = scalar_lea.hbm %s2091_s4, 1024 }
  0x24   :  { %s48_s16 = sshll.u32 %s1636_s15, 4  ;;  %p1607_p2 = scmp.ne.s32.totalorder %s2091_s4, %s1606_s19  ;;  %s49_s16 = int_to_ptr.vmem [resolvable:$true] %s48_s16 }
  0x25   :  { %p1610_p3 = scmp.lt.u32.totalorder %s1606_s19, %s2091_s4 }
  0x27   :  { %p1612_p4 = pnand %p1610_p3, %p1607_p2 }
  0x29   :  { %1615 = shalt.err (!%p1612_p4)
}
  0x2a   :  { %s1616_s24 = scalar_lea.vmem %s49_s16, 1024  ;;  %p1621_p6 = scmp.lt.s32.totalorder %s49_s16, %s49_s16 }
  0x2b   :  { %p1617_p5 = scmp.ne.s32.totalorder %s49_s16, %s1616_s24  ;;  %p1622_p7 = scmp.lt.s32.totalorder %s1616_s24, %s1616_s24 }
  0x2d   :  { %p1623_p8 = por %p1622_p7, %p1621_p6 }
  0x2f   :  { %p1624_p9 = pnand %p1623_p8, %p1617_p5 }
  0x31   :  { %1627 = shalt.err (!%p1624_p9)
}
  0x32   :  { %54 = dma.hbm_to_vmem [thread:$0]  %s2091_s4, 1024, %s49_s16, [#allocation5], %s1634_s3, %s1634_s3, %s1635_s10  }
  0x33   :  { %1628 = dma.done.wait [#allocation3], 256  }
  0x34   :  { %1629 = vsyncadd [#allocation3], 4294967040 }
  0x35   :  { %1630 = dma.done.wait [#allocation5], 1040  }
  0x36   :  { %1631 = vsyncadd [#allocation5], 4294966256  ;;  %v78_v0 = vld [vmem:[%s2088_s1] sm:$0xff]  ;;  %v79_v1 = vld [vmem:[%s2088_s1 + $0x8] sm:$0xff]  ;;  %vm86_vm0 = vcmask 523264   ;;  %vm225_vm1 = vcmask 130048  }
  0x37   :  { %v80_v2 = vld [vmem:[%s2088_s1 + $0x10] sm:$0xff]  ;;  %v1449_v3 = vpack.c.bf16 %v79_v1, %v78_v0  ;;  %v81_v4 = vld [vmem:[%s2088_s1 + $0x18] sm:$0xff]  ;;  %v82_v6 = vld [vmem:[%s2088_s1 + $0x20] sm:$0xff]  ;;  %vm367_vm2 = vcmask 261120  }
  0x38   :  { %v1453_v5 = vpack.c.bf16 %v81_v4, %v80_v2  ;;  %v83_v7 = vld [vmem:[%s2088_s1 + $0x28] sm:$0xff]  ;;  %v1751_v8 = vld [vmem:[%s2087_s0] sm:$0xff]  ;;  %v84_v12 = vld [vmem:[%s2088_s1 + $0x30] sm:$0xff] }
  0x39   :  { %1450 = vmatprep.subr.bf16.mxu0 %v1449_v3  ;;  %1305 = vmatprep.mubr.msk.f32.mxu0 %vm86_vm0, %v1751_v8  ;;  %v1457_v9 = vpack.c.bf16 %v83_v7, %v82_v6  ;;  %v216_v10 = vld [vmem:[#allocation2] sm:$0xff]  ;;  %v217_v11 = vld [vmem:[#allocation2 + $0x8] sm:$0xff]  ;;  %v85_v13 = vld [vmem:[%s2088_s1 + $0x38] sm:$0xff] }
  0x3a   :  { %1452 = vmatpush3.bf16.msra.mxu0 %v1449_v3  ;;  %v1465_v14 = vpack.c.bf16 %v217_v11, %v216_v10  ;;  %v1461_v15 = vpack.c.bf16 %v85_v13, %v84_v12  ;;  %v1764_v16 = vld [vmem:[%s2087_s0 + $0x8] sm:$0xff]  ;;  %v1769_v17 = vld [vmem:[%s2087_s0 + $0x10] sm:$0xff]  ;;  %v1778_v18 = vld [vmem:[%s2087_s0 + $0x18] sm:$0xff] }
  0x3b   :  { %1454 = vmatprep.subr.bf16.mxu0 %v1453_v5  ;;  %v1783_v19 = vld [vmem:[%s2087_s0 + $0x20] sm:$0xff]  ;;  %v1792_v20 = vld [vmem:[%s2087_s0 + $0x28] sm:$0xff]  ;;  %v1797_v21 = vld [vmem:[%s2087_s0 + $0x30] sm:$0xff] }
  0x3c   :  { %1466 = vmatprep.subr.bf16.mxu1 %v1465_v14  ;;  %v1806_v22 = vld [vmem:[%s2087_s0 + $0x38] sm:$0xff]  ;;  %v365_v26 = vld [vmem:[#allocation6 + $0x10] sm:$0xff]  ;;  %v366_v27 = vld [vmem:[#allocation6 + $0x18] sm:$0xff] }
  0x3d   :  { %1468 = vmatpush3.bf16.msra.mxu1 %v1465_v14  ;;  %v363_v23 = vld [vmem:[#allocation6] sm:$0xff]  ;;  %v364_v24 = vld [vmem:[#allocation6 + $0x8] sm:$0xff]  ;;  %v1473_v30 = vpack.c.bf16 %v366_v27, %v365_v26  ;;  %v1142_v37 = vld [vmem:[#allocation4] ss:$0 sm:$0xff] }
  0x3e   :  { %1456 = vmatpush3.bf16.msra.mxu0 %v1453_v5  ;;  %v1469_v25 = vpack.c.bf16 %v364_v24, %v363_v23  ;;  %v626_v62 = vld [vmem:[#allocation6 + $0x20] sm:$0xff]  ;;  %v627_v63 = vld [vmem:[#allocation6 + $0x28] sm:$0xff]  ;;  %v628_v14 = vld [vmem:[#allocation6 + $0x30] sm:$0xff] }
  0x3f   :  { %1458 = vmatprep.subr.bf16.mxu0 %v1457_v9  ;;  %v1493_v0 = vpack.c.bf16 %v627_v63, %v626_v62  ;;  %v1159_v24 = vld [vmem:[%s2092_s5] ss:$0 sm:$0xff] }
  0x40   :  { %1470 = vmatprep.subr.bf16.mxu1 %v1469_v25 }
  0x42   :  { %1460 = vmatpush3.bf16.msra.mxu0 %v1457_v9 }
  0x43   :  { %1462 = vmatprep.subr.bf16.mxu0 %v1461_v15 }
  0x46   :  { %1464 = vmatpush3.bf16.msra.mxu0 %v1461_v15  ;;  %v629_v15 = vld [vmem:[#allocation6 + $0x38] sm:$0xff] }
  0x47   :  { %v1497_v23 = vpack.c.bf16 %v629_v15, %v628_v14 }
  0x49   :  { %1306 = vmatmul.mubr.msk.f32.vlgmr.msra.gmra.mrb[0].mxu0 %vm86_vm0, %v1764_v16 }
  0x4a   :  { %1308 = vmatprep.mubr.msk.f32.mxu0 %vm86_vm0, %v1769_v17 }
  0x4d   :  { %1309 = vmatmul.mubr.msk.f32.gmra.mrb[2].mxu0 %vm86_vm0, %v1778_v18 }
  0x4e   :  { %1311 = vmatprep.mubr.msk.f32.mxu0 %vm86_vm0, %v1783_v19 }
  0x51   :  { %1312 = vmatmul.mubr.msk.f32.gmra.mrb[4].mxu0 %vm86_vm0, %v1792_v20 }
  0x52   :  { %1314 = vmatprep.mubr.msk.f32.mxu0 %vm86_vm0, %v1797_v21 }
  0x55   :  { %1315 = vmatmul.mubr.msk.f32.gmra.mrb[6].mxu0 %vm86_vm0, %v1806_v22 }
  0x56   :  { %1369 = vmatprep.mubr.msk.f32.mxu0 %vm86_vm0, %v1751_v8 }
 0x11c   :  { %v1307_v28 = vpop.f32.mrb[0].mxu0 }
 0x11d   :  { %v177_v29 = vpop.f32.mrb[1].mxu0 }
 0x11e   :  { %1321 = vmatprep.mubr.msk.f32.mxu1 %vm225_vm1, %v177_v29 }
 0x11f   :  { %1322 = vmatmul.mubr.msk.f32.vlgmr.msra.gmra.mrb[0].mxu1 %vm225_vm1, %v1307_v28 }
 0x120   :  { %v1310_v31 = vpop.f32.mrb[2].mxu0  ;;  %1472 = vmatpush3.bf16.msra.mxu1 %v1469_v25 }
 0x121   :  { %v187_v32 = vpop.f32.mrb[3].mxu0  ;;  %1474 = vmatprep.subr.bf16.mxu1 %v1473_v30 }
 0x122   :  { %1324 = vmatprep.mubr.msk.f32.mxu1 %vm225_vm1, %v187_v32 }
 0x123   :  { %1325 = vmatmul.mubr.msk.f32.gmra.mrb[2].mxu1 %vm225_vm1, %v1310_v31 }
 0x124   :  { %v1313_v33 = vpop.f32.mrb[4].mxu0  ;;  %1476 = vmatpush3.bf16.msra.mxu1 %v1473_v30 }
 0x125   :  { %v197_v34 = vpop.f32.mrb[5].mxu0  ;;  %1494 = vmatprep.subr.bf16.mxu1 %v1493_v0 }
 0x126   :  { %1327 = vmatprep.mubr.msk.f32.mxu1 %vm225_vm1, %v197_v34 }
 0x127   :  { %1328 = vmatmul.mubr.msk.f32.gmra.mrb[4].mxu1 %vm225_vm1, %v1313_v33 }
 0x128   :  { %v1316_v35 = vpop.f32.mrb[6].mxu0 }
 0x129   :  { %v207_v36 = vpop.f32.mrb[7].mxu0 }
 0x12a   :  { %1330 = vmatprep.mubr.msk.f32.mxu1 %vm225_vm1, %v207_v36 }
 0x12b   :  { %1331 = vmatmul.mubr.msk.f32.gmra.mrb[6].mxu1 %vm225_vm1, %v1316_v35 }
 0x1f2   :  { %v1323_v38 = vpop.f32.mrb[0].mxu1 }
 0x1f3   :  { %v1820_v39 = vadd.f32 %v1323_v38, %v1142_v37  ;;  %v316_v40 = vpop.f32.mrb[1].mxu1 }
 0x1f4   :  { %v1822_v41 = vadd.f32 %v1142_v37, %v316_v40 }
 0x1f5   :  { %v356_v44 = vmax.f32 %v1820_v39, 0.0 }
 0x1f6   :  { %v355_v42 = vmax.f32 %v1822_v41, 0.0  ;;  %v1326_v43 = vpop.f32.mrb[2].mxu1 }
 0x1f7   :  { %v1826_v45 = vadd.f32 %v1326_v43, %v1142_v37  ;;  %v326_v46 = vpop.f32.mrb[3].mxu1 }
 0x1f8   :  { %v1828_v47 = vadd.f32 %v1142_v37, %v326_v46  ;;  %1341 = vmatprep.mubr.msk.f32.mxu1 %vm367_vm2, %v355_v42 }
 0x1f9   :  { %1342 = vmatmul.mubr.msk.f32.vlgmr.msra.gmra.mrb[8].mxu1 %vm367_vm2, %v356_v44  ;;  %v358_v50 = vmax.f32 %v1826_v45, 0.0 }
 0x1fa   :  { %v357_v48 = vmax.f32 %v1828_v47, 0.0  ;;  %v1329_v49 = vpop.f32.mrb[4].mxu1  ;;  %1496 = vmatpush3.bf16.msra.mxu1 %v1493_v0 }
 0x1fb   :  { %v1838_v51 = vadd.f32 %v1329_v49, %v1142_v37  ;;  %v336_v52 = vpop.f32.mrb[5].mxu1  ;;  %1498 = vmatprep.subr.bf16.mxu1 %v1497_v23 }
 0x1fc   :  { %v1840_v53 = vadd.f32 %v1142_v37, %v336_v52  ;;  %1344 = vmatprep.mubr.msk.f32.mxu1 %vm367_vm2, %v357_v48 }
 0x1fd   :  { %1345 = vmatmul.mubr.msk.f32.gmra.mrb[10].mxu1 %vm367_vm2, %v358_v50  ;;  %v360_v56 = vmax.f32 %v1838_v51, 0.0 }
 0x1fe   :  { %v359_v54 = vmax.f32 %v1840_v53, 0.0  ;;  %v1332_v55 = vpop.f32.mrb[6].mxu1  ;;  %1500 = vmatpush3.bf16.msra.mxu1 %v1497_v23 }
 0x1ff   :  { %v1850_v57 = vadd.f32 %v1332_v55, %v1142_v37  ;;  %v346_v58 = vpop.f32.mrb[7].mxu1 }
 0x200   :  { %v1852_v59 = vadd.f32 %v1142_v37, %v346_v58  ;;  %1347 = vmatprep.mubr.msk.f32.mxu1 %vm367_vm2, %v359_v54 }
 0x201   :  { %1348 = vmatmul.mubr.msk.f32.gmra.mrb[12].mxu1 %vm367_vm2, %v360_v56  ;;  %v362_v61 = vmax.f32 %v1850_v57, 0.0  ;;  %v889_v57 = vld [vmem:[%s2093_s6 + $0x8] sm:$0xff] }
 0x202   :  { %v361_v60 = vmax.f32 %v1852_v59, 0.0 }
 0x204   :  { %1350 = vmatprep.mubr.msk.f32.mxu1 %vm367_vm2, %v361_v60 }
 0x205   :  { %1351 = vmatmul.mubr.msk.f32.gmra.mrb[14].mxu1 %vm367_vm2, %v362_v61 }
 0x2cc   :  { %v1343_v1 = vpop.f32.mrb[8].mxu1 }
 0x2cd   :  { %v458_v2 = vpop.f32.mrb[9].mxu1 }
 0x2ce   :  { %v1477_v3 = vpack.c.bf16 %v1343_v1, %v458_v2 }
 0x2d0   :  { %v1346_v4 = vpop.f32.mrb[10].mxu1  ;;  %1478 = vmatprep.subr.bf16.mxu0 %v1477_v3 }
 0x2d1   :  { %v468_v5 = vpop.f32.mrb[11].mxu1  ;;  %1480 = vmatpush3.bf16.msra.mxu0 %v1477_v3 }
 0x2d2   :  { %v1481_v6 = vpack.c.bf16 %v1346_v4, %v468_v5 }
 0x2d4   :  { %v1349_v7 = vpop.f32.mrb[12].mxu1  ;;  %1482 = vmatprep.subr.bf16.mxu0 %v1481_v6 }
 0x2d5   :  { %v478_v9 = vpop.f32.mrb[13].mxu1  ;;  %1484 = vmatpush3.bf16.msra.mxu0 %v1481_v6 }
 0x2d6   :  { %v1485_v10 = vpack.c.bf16 %v1349_v7, %v478_v9 }
 0x2d8   :  { %v1352_v11 = vpop.f32.mrb[14].mxu1  ;;  %1486 = vmatprep.subr.bf16.mxu0 %v1485_v10 }
 0x2d9   :  { %v488_v12 = vpop.f32.mrb[15].mxu1  ;;  %1488 = vmatpush3.bf16.msra.mxu0 %v1485_v10 }
 0x2da   :  { %v1489_v13 = vpack.c.bf16 %v1352_v11, %v488_v12 }
 0x2dc   :  { %1490 = vmatprep.subr.bf16.mxu0 %v1489_v13 }
 0x2dd   :  { %1492 = vmatpush3.bf16.msra.mxu0 %v1489_v13 }
 0x2e0   :  { %1370 = vmatmul.mubr.msk.f32.vlgmr.msra.gmra.mrb[8].mxu0 %vm86_vm0, %v1764_v16 }
 0x2e1   :  { %1372 = vmatprep.mubr.msk.f32.mxu0 %vm86_vm0, %v1769_v17 }
 0x2e4   :  { %1373 = vmatmul.mubr.msk.f32.gmra.mrb[10].mxu0 %vm86_vm0, %v1778_v18 }
 0x2e5   :  { %1375 = vmatprep.mubr.msk.f32.mxu0 %vm86_vm0, %v1783_v19 }
 0x2e8   :  { %1376 = vmatmul.mubr.msk.f32.gmra.mrb[12].mxu0 %vm86_vm0, %v1792_v20 }
 0x2e9   :  { %1378 = vmatprep.mubr.msk.f32.mxu0 %vm86_vm0, %v1797_v21 }
 0x2ec   :  { %1379 = vmatmul.mubr.msk.f32.gmra.mrb[14].mxu0 %vm86_vm0, %v1806_v22 }
 0x2ed   :  { %1417 = vmatprep.mubr.msk.f32.mxu0 %vm86_vm0, %v1751_v8 }
 0x3b3   :  { %v1371_v25 = vpop.f32.mrb[8].mxu0 }
 0x3b4   :  { %v576_v26 = vadd.f32 %v1371_v25, %v1159_v24  ;;  %v570_v27 = vpop.f32.mrb[9].mxu0 }
 0x3b5   :  { %v571_v28 = vadd.f32 %v1159_v24, %v570_v27 }
 0x3b6   :  { %v1889_v29 = vadd.f32 %v576_v26, %v356_v44 }
 0x3b7   :  { %v1893_v8 = vadd.f32 %v571_v28, %v355_v42  ;;  %v1374_v30 = vpop.f32.mrb[10].mxu0 }
 0x3b8   :  { %v586_v31 = vadd.f32 %v1374_v30, %v1159_v24  ;;  %v580_v32 = vpop.f32.mrb[11].mxu0  ;;  %v618_v35 = vmax.f32 %v1889_v29, 0.0 }
 0x3b9   :  { %v617_v33 = vmax.f32 %v1893_v8, 0.0  ;;  %v581_v34 = vadd.f32 %v1159_v24, %v580_v32 }
 0x3ba   :  { %v1899_v36 = vadd.f32 %v586_v31, %v358_v50 }
 0x3bb   :  { %v1903_v37 = vadd.f32 %v581_v34, %v357_v48  ;;  %v1377_v38 = vpop.f32.mrb[12].mxu0  ;;  %1389 = vmatprep.mubr.msk.f32.mxu1 %vm367_vm2, %v617_v33 }
 0x3bc   :  { %v596_v39 = vadd.f32 %v1377_v38, %v1159_v24  ;;  %v590_v40 = vpop.f32.mrb[13].mxu0  ;;  %1390 = vmatmul.mubr.msk.f32.vlgmr.msra.gmra.mrb[16].mxu1 %vm367_vm2, %v618_v35  ;;  %v620_v43 = vmax.f32 %v1899_v36, 0.0 }
 0x3bd   :  { %v619_v41 = vmax.f32 %v1903_v37, 0.0  ;;  %v591_v42 = vadd.f32 %v1159_v24, %v590_v40 }
 0x3be   :  { %v1915_v44 = vadd.f32 %v596_v39, %v360_v56  ;;  %v888_v56 = vld [vmem:[%s2093_s6] sm:$0xff] }
 0x3bf   :  { %v1919_v45 = vadd.f32 %v591_v42, %v359_v54  ;;  %v1380_v46 = vpop.f32.mrb[14].mxu0  ;;  %1392 = vmatprep.mubr.msk.f32.mxu1 %vm367_vm2, %v619_v41  ;;  %v1517_v58 = vpack.c.bf16 %v889_v57, %v888_v56 }
 0x3c0   :  { %v606_v47 = vadd.f32 %v1380_v46, %v1159_v24  ;;  %v600_v48 = vpop.f32.mrb[15].mxu0  ;;  %1393 = vmatmul.mubr.msk.f32.gmra.mrb[18].mxu1 %vm367_vm2, %v620_v43  ;;  %v622_v51 = vmax.f32 %v1915_v44, 0.0 }
 0x3c1   :  { %v621_v49 = vmax.f32 %v1919_v45, 0.0  ;;  %v601_v50 = vadd.f32 %v1159_v24, %v600_v48  ;;  %1518 = vmatprep.subr.bf16.mxu1 %v1517_v58 }
 0x3c2   :  { %v1931_v52 = vadd.f32 %v606_v47, %v362_v61  ;;  %1520 = vmatpush3.bf16.msra.mxu1 %v1517_v58 }
 0x3c3   :  { %v1935_v53 = vadd.f32 %v601_v50, %v361_v60  ;;  %1395 = vmatprep.mubr.msk.f32.mxu1 %vm367_vm2, %v621_v49 }
 0x3c4   :  { %1396 = vmatmul.mubr.msk.f32.gmra.mrb[20].mxu1 %vm367_vm2, %v622_v51  ;;  %v624_v55 = vmax.f32 %v1931_v52, 0.0 }
 0x3c5   :  { %v623_v54 = vmax.f32 %v1935_v53, 0.0 }
 0x3c7   :  { %1398 = vmatprep.mubr.msk.f32.mxu1 %vm367_vm2, %v623_v54 }
 0x3c8   :  { %1399 = vmatmul.mubr.msk.f32.gmra.mrb[22].mxu1 %vm367_vm2, %v624_v55 }
 0x48f   :  { %v1391_v59 = vpop.f32.mrb[16].mxu1 }
 0x490   :  { %v720_v60 = vpop.f32.mrb[17].mxu1 }
 0x491   :  { %v1501_v61 = vpack.c.bf16 %v1391_v59, %v720_v60 }
 0x493   :  { %v1394_v62 = vpop.f32.mrb[18].mxu1  ;;  %1502 = vmatprep.subr.bf16.mxu0 %v1501_v61 }
 0x494   :  { %v730_v63 = vpop.f32.mrb[19].mxu1  ;;  %1504 = vmatpush3.bf16.msra.mxu0 %v1501_v61 }
 0x495   :  { %v1505_v0 = vpack.c.bf16 %v1394_v62, %v730_v63 }
 0x497   :  { %v1397_v1 = vpop.f32.mrb[20].mxu1  ;;  %1506 = vmatprep.subr.bf16.mxu0 %v1505_v0 }
 0x498   :  { %v740_v2 = vpop.f32.mrb[21].mxu1  ;;  %1508 = vmatpush3.bf16.msra.mxu0 %v1505_v0 }
 0x499   :  { %v1509_v3 = vpack.c.bf16 %v1397_v1, %v740_v2 }
 0x49b   :  { %v1400_v4 = vpop.f32.mrb[22].mxu1  ;;  %1510 = vmatprep.subr.bf16.mxu0 %v1509_v3 }
 0x49c   :  { %v750_v5 = vpop.f32.mrb[23].mxu1  ;;  %1512 = vmatpush3.bf16.msra.mxu0 %v1509_v3 }
 0x49d   :  { %v1513_v6 = vpack.c.bf16 %v1400_v4, %v750_v5 }
 0x49f   :  { %1514 = vmatprep.subr.bf16.mxu0 %v1513_v6 }
 0x4a0   :  { %1516 = vmatpush3.bf16.msra.mxu0 %v1513_v6 }
 0x4a3   :  { %1418 = vmatmul.mubr.msk.f32.vlgmr.msra.gmra.mrb[16].mxu0 %vm86_vm0, %v1764_v16  ;;  %v890_v16 = vld [vmem:[%s2093_s6 + $0x10] sm:$0xff] }
 0x4a4   :  { %1420 = vmatprep.mubr.msk.f32.mxu0 %vm86_vm0, %v1769_v17  ;;  %v891_v17 = vld [vmem:[%s2093_s6 + $0x18] sm:$0xff] }
 0x4a7   :  { %1421 = vmatmul.mubr.msk.f32.gmra.mrb[18].mxu0 %vm86_vm0, %v1778_v18  ;;  %v1521_v18 = vpack.c.bf16 %v891_v17, %v890_v16 }
 0x4a8   :  { %1423 = vmatprep.mubr.msk.f32.mxu0 %vm86_vm0, %v1783_v19  ;;  %v1177_v19 = vld [vmem:[%s2092_s5 + $0x1] ss:$0 sm:$0xff] }
 0x4a9   :  { %1522 = vmatprep.subr.bf16.mxu1 %v1521_v18 }
 0x4aa   :  { %1524 = vmatpush3.bf16.msra.mxu1 %v1521_v18 }
 0x4ab   :  { %1424 = vmatmul.mubr.msk.f32.gmra.mrb[20].mxu0 %vm86_vm0, %v1792_v20 }
 0x4ac   :  { %1426 = vmatprep.mubr.msk.f32.mxu0 %vm86_vm0, %v1797_v21 }
 0x4af   :  { %1427 = vmatmul.mubr.msk.f32.gmra.mrb[22].mxu0 %vm86_vm0, %v1806_v22 }
 0x576   :  { %v1419_v20 = vpop.f32.mrb[16].mxu0 }
 0x577   :  { %v839_v21 = vadd.f32 %v1419_v20, %v1177_v19  ;;  %v833_v7 = vpop.f32.mrb[17].mxu0 }
 0x578   :  { %v834_v9 = vadd.f32 %v1177_v19, %v833_v7 }
 0x579   :  { %v873_v22 = vadd.f32 %v839_v21, %v618_v35 }
 0x57a   :  { %v872_v10 = vadd.f32 %v834_v9, %v617_v33  ;;  %v1422_v11 = vpop.f32.mrb[18].mxu0 }
 0x57b   :  { %v849_v12 = vadd.f32 %v1422_v11, %v1177_v19  ;;  %v843_v13 = vpop.f32.mrb[19].mxu0  ;;  %v881_v23 = vmax.f32 %v873_v22, 0.0 }
 0x57c   :  { %v880_v14 = vmax.f32 %v872_v10, 0.0  ;;  %v844_v15 = vadd.f32 %v1177_v19, %v843_v13 }
 0x57d   :  { %v875_v24 = vadd.f32 %v849_v12, %v620_v43  ;;  %v1186_v43 = vld [vmem:[%s2094_s7] ss:$0 sm:$0xff] }
 0x57e   :  { %v874_v25 = vadd.f32 %v844_v15, %v619_v41  ;;  %v1425_v26 = vpop.f32.mrb[20].mxu0  ;;  %1437 = vmatprep.mubr.msk.f32.mxu1 %vm367_vm2, %v880_v14 }
 0x57f   :  { %v859_v27 = vadd.f32 %v1425_v26, %v1177_v19  ;;  %v853_v28 = vpop.f32.mrb[21].mxu0  ;;  %1438 = vmatmul.mubr.msk.f32.vlgmr.msra.gmra.mrb[24].mxu1 %vm367_vm2, %v881_v23  ;;  %v883_v30 = vmax.f32 %v875_v24, 0.0 }
 0x580   :  { %v882_v29 = vmax.f32 %v874_v25, 0.0  ;;  %v854_v8 = vadd.f32 %v1177_v19, %v853_v28 }
 0x581   :  { %v877_v31 = vadd.f32 %v859_v27, %v622_v51 }
 0x582   :  { %v876_v32 = vadd.f32 %v854_v8, %v621_v49  ;;  %v1428_v33 = vpop.f32.mrb[22].mxu0  ;;  %1440 = vmatprep.mubr.msk.f32.mxu1 %vm367_vm2, %v882_v29 }
 0x583   :  { %v869_v34 = vadd.f32 %v1428_v33, %v1177_v19  ;;  %v863_v35 = vpop.f32.mrb[23].mxu0  ;;  %1441 = vmatmul.mubr.msk.f32.gmra.mrb[26].mxu1 %vm367_vm2, %v883_v30  ;;  %v885_v38 = vmax.f32 %v877_v31, 0.0 }
 0x584   :  { %v884_v36 = vmax.f32 %v876_v32, 0.0  ;;  %v864_v37 = vadd.f32 %v1177_v19, %v863_v35 }
 0x585   :  { %v879_v39 = vadd.f32 %v869_v34, %v624_v55 }
 0x586   :  { %v878_v40 = vadd.f32 %v864_v37, %v623_v54  ;;  %1443 = vmatprep.mubr.msk.f32.mxu1 %vm367_vm2, %v884_v36 }
 0x587   :  { %1444 = vmatmul.mubr.msk.f32.gmra.mrb[28].mxu1 %vm367_vm2, %v885_v38  ;;  %v887_v42 = vmax.f32 %v879_v39, 0.0 }
 0x588   :  { %v886_v41 = vmax.f32 %v878_v40, 0.0 }
 0x58a   :  { %1446 = vmatprep.mubr.msk.f32.mxu1 %vm367_vm2, %v886_v41 }
 0x58b   :  { %1447 = vmatmul.mubr.msk.f32.gmra.mrb[30].mxu1 %vm367_vm2, %v887_v42 }
 0x652   :  { %v1439_v44 = vpop.f32.mrb[24].mxu1 }
 0x653   :  { %v995_v45 = vadd.f32 %v1439_v44, %v1186_v43  ;;  %v989_v46 = vpop.f32.mrb[25].mxu1 }
 0x654   :  { %v990_v47 = vadd.f32 %v1186_v43, %v989_v46 }
 0x655   :  { %1029 = vst [vmem:[%s2096_s9 + $0x8] sm:$0xff] %v995_v45  ;;  %1038 = vmax.xlane.f32.xlu0 %v995_v45 }
 0x656   :  { %1028 = vst [vmem:[%s2096_s9] sm:$0xff] %v990_v47  ;;  %v1442_v48 = vpop.f32.mrb[26].mxu1 }
 0x657   :  { %v1005_v49 = vadd.f32 %v1442_v48, %v1186_v43  ;;  %v999_v50 = vpop.f32.mrb[27].mxu1 }
 0x658   :  { %v1000_v51 = vadd.f32 %v1186_v43, %v999_v50 }
 0x659   :  { %1031 = vst [vmem:[%s2096_s9 + $0x18] sm:$0xff] %v1005_v49  ;;  %1042 = vmax.xlane.f32.xlu1 %v1005_v49  ;;  %1036 = vmax.xlane.f32.xlu0 %v990_v47 }
 0x65a   :  { %1030 = vst [vmem:[%s2096_s9 + $0x10] sm:$0xff] %v1000_v51  ;;  %v1445_v52 = vpop.f32.mrb[28].mxu1 }
 0x65b   :  { %v1015_v53 = vadd.f32 %v1445_v52, %v1186_v43  ;;  %v1009_v54 = vpop.f32.mrb[29].mxu1 }
 0x65c   :  { %v1010_v55 = vadd.f32 %v1186_v43, %v1009_v54 }
 0x65d   :  { %1033 = vst [vmem:[%s2096_s9 + $0x28] sm:$0xff] %v1015_v53  ;;  %1040 = vmax.xlane.f32.xlu1 %v1000_v51 }
 0x65e   :  { %1032 = vst [vmem:[%s2096_s9 + $0x20] sm:$0xff] %v1010_v55  ;;  %v1448_v56 = vpop.f32.mrb[30].mxu1  ;;  %1044 = vmax.xlane.f32.xlu0 %v1010_v55 }
 0x65f   :  { %v1025_v57 = vadd.f32 %v1448_v56, %v1186_v43  ;;  %v1019_v58 = vpop.f32.mrb[31].mxu1 }
 0x660   :  { %v1020_v59 = vadd.f32 %v1186_v43, %v1019_v58 }
 0x661   :  { %1035 = vst [vmem:[%s2096_s9 + $0x38] sm:$0xff] %v1025_v57  ;;  %1046 = vmax.xlane.f32.xlu1 %v1015_v53 }
 0x662   :  { %1034 = vst [vmem:[%s2096_s9 + $0x30] sm:$0xff] %v1020_v59  ;;  %1048 = vmax.xlane.f32.xlu0 %v1020_v59 }
 0x665   :  { %1050 = vmax.xlane.f32.xlu1 %v1025_v57 }
 0x6e2   :  { %v1039_v60 = vpop.xlane.xlu0 %1038 }
 0x6e3   :  { %v2031_v61 = vsub.f32 %v995_v45, %v1039_v60 }
 0x6e5   :  { %v1062_v62 = vmul.f32 1.442695, %v2031_v61 }
 0x6e6   :  { %v1043_v63 = vpop.xlane.xlu1 %1042  ;;  %v1037_v0 = vpop.xlane.xlu0 %1036 }
 0x6e7   :  { %1530 = vpow2.f32 %v1062_v62  ;;  %v2034_v1 = vsub.f32 %v1005_v49, %v1043_v63  ;;  %v2036_v2 = vsub.f32 %v990_v47, %v1037_v0 }
 0x6e9   :  { %v1066_v3 = vmul.f32 1.442695, %v2034_v1  ;;  %v1060_v4 = vmul.f32 1.442695, %v2036_v2 }
 0x6ea   :  { %v1041_v5 = vpop.xlane.xlu1 %1040 }
 0x6eb   :  { %1532 = vpow2.f32 %v1066_v3  ;;  %v2040_v6 = vsub.f32 %v1000_v51, %v1041_v5  ;;  %v1045_v16 = vpop.xlane.xlu0 %1044 }
 0x6ec   :  { %1534 = vpow2.f32 %v1060_v4  ;;  %v2042_v17 = vsub.f32 %v1010_v55, %v1045_v16 }
 0x6ed   :  { %v1064_v18 = vmul.f32 1.442695, %v2040_v6 }
 0x6ee   :  { %v1047_v19 = vpop.xlane.xlu1 %1046  ;;  %v1068_v7 = vmul.f32 1.442695, %v2042_v17 }
 0x6ef   :  { %1536 = vpow2.f32 %v1064_v18  ;;  %v2045_v20 = vsub.f32 %v1015_v53, %v1047_v19  ;;  %v1049_v21 = vpop.xlane.xlu0 %1048 }
 0x6f0   :  { %v2048_v9 = vsub.f32 %v1020_v59, %v1049_v21 }
 0x6f1   :  { %v1531_v22 = vpop.eup %1530  ;;  %v1070_v10 = vmul.f32 1.442695, %v2045_v20 }
 0x6f2   :  { %1078 = vadd.xlane.f32.xlu1 %v1531_v22  ;;  %v1051_v11 = vpop.xlane.xlu1 %1050  ;;  %v1072_v13 = vmul.f32 1.442695, %v2048_v9 }
 0x6f3   :  { %1538 = vpow2.f32 %v1070_v10  ;;  %v2051_v12 = vsub.f32 %v1025_v57, %v1051_v11 }
 0x6f4   :  { %1540 = vpow2.f32 %v1068_v7 }
 0x6f5   :  { %v1533_v14 = vpop.eup %1532  ;;  %v1074_v15 = vmul.f32 1.442695, %v2051_v12 }
 0x6f6   :  { %v1535_v23 = vpop.eup %1534  ;;  %1082 = vadd.xlane.f32.xlu1 %v1533_v14 }
 0x6f7   :  { %1542 = vpow2.f32 %v1074_v15  ;;  %1076 = vadd.xlane.f32.xlu0 %v1535_v23 }
 0x6f8   :  { %1544 = vpow2.f32 %v1072_v13 }
 0x6f9   :  { %v1537_v24 = vpop.eup %1536 }
 0x6fb   :  { %1080 = vadd.xlane.f32.xlu0 %v1537_v24 }
 0x6fd   :  { %v1539_v25 = vpop.eup %1538 }
 0x6fe   :  { %v1541_v26 = vpop.eup %1540  ;;  %1086 = vadd.xlane.f32.xlu1 %v1539_v25 }
 0x6ff   :  { %1084 = vadd.xlane.f32.xlu0 %v1541_v26 }
 0x701   :  { %v1543_v27 = vpop.eup %1542 }
 0x702   :  { %v1545_v28 = vpop.eup %1544  ;;  %1090 = vadd.xlane.f32.xlu1 %v1543_v27 }
 0x703   :  { %1088 = vadd.xlane.f32.xlu0 %v1545_v28 }
 0x77f   :  { %v1079_v29 = vpop.xlane.xlu1 %1078 }
 0x780   :  { %1546 = vlog2.f32 %v1079_v29 }
 0x783   :  { %v1083_v8 = vpop.xlane.xlu1 %1082 }
 0x784   :  { %1548 = vlog2.f32 %v1083_v8  ;;  %v1077_v30 = vpop.xlane.xlu0 %1076 }
 0x785   :  { %1550 = vlog2.f32 %v1077_v30 }
 0x788   :  { %v1081_v31 = vpop.xlane.xlu0 %1080 }
 0x789   :  { %1552 = vlog2.f32 %v1081_v31 }
 0x78a   :  { %v1547_v32 = vpop.eup %1546 }
 0x78b   :  { %v1095_v33 = vmul.f32 0.6931472, %v1547_v32  ;;  %v1087_v34 = vpop.xlane.xlu1 %1086 }
 0x78c   :  { %1554 = vlog2.f32 %v1087_v34  ;;  %v1085_v35 = vpop.xlane.xlu0 %1084 }
 0x78d   :  { %v1109_v36 = vsub.f32 %v2031_v61, %v1095_v33  ;;  %1556 = vlog2.f32 %v1085_v35 }
 0x78e   :  { %v1549_v37 = vpop.eup %1548 }
 0x78f   :  { %v1551_v38 = vpop.eup %1550  ;;  %1117 = vst [vmem:[%s2095_s8 + $0x8] sm:$0xff] %v1109_v36  ;;  %v1099_v39 = vmul.f32 0.6931472, %v1549_v37  ;;  %v1091_v40 = vpop.xlane.xlu1 %1090 }
 0x790   :  { %v1093_v41 = vmul.f32 0.6931472, %v1551_v38  ;;  %1558 = vlog2.f32 %v1091_v40  ;;  %v1089_v42 = vpop.xlane.xlu0 %1088 }
 0x791   :  { %v1111_v43 = vsub.f32 %v2034_v1, %v1099_v39  ;;  %1560 = vlog2.f32 %v1089_v42 }
 0x792   :  { %v1108_v44 = vsub.f32 %v2036_v2, %v1093_v41 }
 0x793   :  { %v1553_v45 = vpop.eup %1552  ;;  %1119 = vst [vmem:[%s2095_s8 + $0x18] sm:$0xff] %v1111_v43 }
 0x794   :  { %1116 = vst [vmem:[%s2095_s8] sm:$0xff] %v1108_v44  ;;  %v1097_v46 = vmul.f32 0.6931472, %v1553_v45 }
 0x796   :  { %v1555_v47 = vpop.eup %1554  ;;  %v1110_v48 = vsub.f32 %v2040_v6, %v1097_v46 }
 0x797   :  { %v1557_v49 = vpop.eup %1556  ;;  %v1103_v50 = vmul.f32 0.6931472, %v1555_v47 }
 0x798   :  { %1118 = vst [vmem:[%s2095_s8 + $0x10] sm:$0xff] %v1110_v48  ;;  %v1101_v51 = vmul.f32 0.6931472, %v1557_v49 }
 0x799   :  { %v1113_v52 = vsub.f32 %v2045_v20, %v1103_v50 }
 0x79a   :  { %v1559_v53 = vpop.eup %1558  ;;  %v1112_v54 = vsub.f32 %v2042_v17, %v1101_v51 }
 0x79b   :  { %v1561_v55 = vpop.eup %1560  ;;  %1121 = vst [vmem:[%s2095_s8 + $0x28] sm:$0xff] %v1113_v52  ;;  %v1107_v56 = vmul.f32 0.6931472, %v1559_v53 }
 0x79c   :  { %1120 = vst [vmem:[%s2095_s8 + $0x20] sm:$0xff] %v1112_v54  ;;  %v1105_v57 = vmul.f32 0.6931472, %v1561_v55 }
 0x79d   :  { %v1115_v58 = vsub.f32 %v2051_v12, %v1107_v56 }
 0x79e   :  { %v1114_v59 = vsub.f32 %v2048_v9, %v1105_v57 }
 0x79f   :  { %1123 = vst [vmem:[%s2095_s8 + $0x38] sm:$0xff] %v1115_v58 }
 0x7a0   :  { %1122 = vst [vmem:[%s2095_s8 + $0x30] sm:$0xff] %v1114_v59 }
 0x7a1   :  { %1132 = vsyncpa [#allocation3], 1 }
 0x7a2   :  { %1133 = vsyncpa [#allocation5], 1 }

</bundles_post_ra>
